<compile_context>
chip_gen: v7x
topology: tpu7x:2x2x1
jax: 0.10.0
libtpu: 0.0.40
codegen_flags: <defaults>
</compile_context>

<pallas_src>
import numpy as np
import jax
import jax.numpy as jnp
from jax import lax
from jax.experimental import pallas as pl
from jax.experimental.pallas import tpu as pltpu


def _round_up(x, m):
    return ((x + m - 1) // m) * m


def _make_multitask_kernel(C, F, rows, Wq, KH, KW):
    """One grid step (b, t): conv over a halo row-tile, masked partial pooling,
    feature accumulation in VMEM scratch; fused head GEMM on the last tile."""

    def kernel(x_ref, convw_ref, convb_ref, mask_ref, wh_ref, bh_ref,
               out_ref, acc_ref):
        t = pl.program_id(1)

        # 3x3 'same' conv over this row tile as KH*KW shifted accumulating
        # matmuls (no im2col materialization in HBM).  x_ref is the flattened
        # padded halo tile, shape (lt_pad, C); row q = lr*Wq + p of `conv`
        # is the conv output at (output row lr of this tile, output col p).
        conv = jnp.zeros((rows, F), jnp.float32)
        for i in range(KH):
            for j in range(KW):
                off = i * Wq + j
                lhs = x_ref[off:off + rows, :]                       # (rows, C)
                w_tap = convw_ref[i * KW + j]                        # (C, F)
                conv = conv + jnp.dot(lhs, w_tap,
                                      preferred_element_type=jnp.float32)

        act = jnp.maximum(conv + convb_ref[...], 0.0)                # (rows, F)

        # Masked global-average-pool partial sum for this tile:
        # mask is 1/(H*W) at valid output columns (p < W), 0 at the KW-1
        # wrapped columns.  (1, rows) @ (rows, F) -> (1, F).
        partial = jnp.dot(mask_ref[...], act,
                          preferred_element_type=jnp.float32)

        @pl.when(t == 0)
        def _():
            acc_ref[...] = jnp.zeros_like(acc_ref)

        acc_ref[...] += partial

        # Finalize on the last tile: fused (lane-dense, 128-padded) head GEMM.
        @pl.when(t == pl.num_programs(1) - 1)
        def _():
            feats = acc_ref[...]                                     # (1, F)
            out_ref[...] = (jnp.dot(feats, wh_ref[...],
                                    preferred_element_type=jnp.float32)
                            + bh_ref[...])                           # (1, P)

    return kernel


class MultiTaskPallas:
    """Pallas port of MultiTask with a synthetic conv backbone."""

    def __init__(self, key, in_channels=4, num_features=32, num_classes=10,
                 use_adv_classif=False, use_is_adv=True, kh=3, kw=3):
        self.in_channels = in_channels
        self.num_features = num_features
        self.num_classes = num_classes
        self.kh, self.kw = kh, kw

        ks = jax.random.split(key, 8)
        s = 0.1
        # Backbone conv weights, HWIO layout: (KH, KW, C, F)
        self.conv_w = s * jax.random.normal(
            ks[0], (kh, kw, in_channels, num_features), jnp.float32)
        self.conv_b = s * jax.random.normal(ks[1], (num_features,), jnp.float32)
        # classif_true: Linear(F, num_classes); stored as (in, out)
        self.w_true = s * jax.random.normal(ks[2], (num_features, num_classes), jnp.float32)
        self.b_true = s * jax.random.normal(ks[3], (num_classes,), jnp.float32)
        # classif_adv_class (optional)
        self.w_adv = self.b_adv = None
        if use_adv_classif:
            self.w_adv = s * jax.random.normal(ks[4], (num_features, num_classes), jnp.float32)
            self.b_adv = s * jax.random.normal(ks[5], (num_classes,), jnp.float32)
        # classif_is_adv (optional)
        self.w_is = self.b_is = None
        if use_is_adv:
            self.w_is = s * jax.random.normal(ks[6], (num_features, 2), jnp.float32)
            self.b_is = s * jax.random.normal(ks[7], (2,), jnp.float32)

    def _heads(self):
        heads = [(self.w_true, self.b_true)]            # 'class_true'
        if self.w_adv is not None:
            heads.append((self.w_adv, self.b_adv))      # 'class_adv'
        if self.w_is is not None:
            heads.append((self.w_is, self.b_is))        # 'is_adv'
        return heads

    def __call__(self, x_nchw, tile_h=8):
        B, C, H, W = x_nchw.shape
        assert C == self.in_channels
        F = self.num_features
        KH, KW = self.kh, self.kw
        ph, pw = KH // 2, KW // 2
        HW = H * W

        TH = tile_h if (H % tile_h == 0 and H >= tile_h) else H
        n_t = H // TH
        Wq = W + 2 * pw                       # padded width
        rows = TH * Wq                        # conv rows computed per tile
        lt = (TH + KH - 1) * Wq               # flattened halo tile length
        lt_pad = _round_up(lt + (KW - 1), 8)  # room for the largest shift

        # ---- glue (plain JAX): NCHW -> NHWC, zero 'same' pad, halo row tiles ----
        x_nhwc = jnp.transpose(x_nchw, (0, 2, 3, 1)).astype(jnp.float32)
        x_pad = jnp.pad(x_nhwc, ((0, 0), (ph, ph), (pw, pw), (0, 0)))
        tiles = [x_pad[:, t * TH: t * TH + TH + (KH - 1), :, :] for t in range(n_t)]
        x_tiles = jnp.stack(tiles, axis=1).reshape(B, n_t, lt, C)
        x_tiles = jnp.pad(x_tiles, ((0, 0), (0, 0), (0, lt_pad - lt), (0, 0)))

        # Conv weights as (KH*KW, C, F) tap slabs; bias as (1, F).
        conv_w_taps = self.conv_w.reshape(KH * KW, C, F)
        conv_b_row = self.conv_b.reshape(1, F)

        # Per-tile masked-average pooling row vector (~rows*4 bytes), replacing
        # the old dense (B, B*HW) zero-padded pooling matrix.
        col = np.arange(rows) % Wq
        pool_mask = jnp.asarray(
            (col < W).astype(np.float32) / float(HW)).reshape(1, rows)

        # Fuse all heads into one GEMM; pad the output dim to 128 lanes so the
        # single output store is lane-dense (no masked vst).
        heads = self._heads()
        out_dims = [w.shape[1] for (w, _) in heads]
        P = _round_up(sum(out_dims), 128)
        wh = jnp.zeros((F, P), jnp.float32)
        bh = jnp.zeros((1, P), jnp.float32)
        off = 0
        for (w, b) in heads:
            wh = wh.at[:, off:off + w.shape[1]].set(w)
            bh = bh.at[:, off:off + w.shape[1]].set(b.reshape(1, -1))
            off += w.shape[1]

        kernel = _make_multitask_kernel(C, F, rows, Wq, KH, KW)

        out = pl.pallas_call(
            kernel,
            out_shape=jax.ShapeDtypeStruct((B, 1, P), jnp.float32),
            grid=(B, n_t),
            in_specs=[
                # halo row tile of the padded input, per (batch, tile)
                pl.BlockSpec((None, None, lt_pad, C), lambda b, t: (b, t, 0, 0)),
                pl.BlockSpec((KH * KW, C, F), lambda b, t: (0, 0, 0)),
                pl.BlockSpec((1, F), lambda b, t: (0, 0)),
                pl.BlockSpec((1, rows), lambda b, t: (0, 0)),
                pl.BlockSpec((F, P), lambda b, t: (0, 0)),
                pl.BlockSpec((1, P), lambda b, t: (0, 0)),
            ],
            out_specs=pl.BlockSpec((None, 1, P), lambda b, t: (b, 0, 0)),
            scratch_shapes=[pltpu.VMEM((1, F), jnp.float32)],
            compiler_params=pltpu.CompilerParams(
                dimension_semantics=("parallel", "arbitrary"),
                vmem_limit_bytes=32 * 1024 * 1024),
        )(x_tiles, conv_w_taps, conv_b_row, pool_mask, wh, bh)

        out = out.reshape(B, P)
        # Slice per-head logits; tuple order matches MultiTask.forward.
        outs, off = [], 0
        for d in out_dims:
            outs.append(out[:, off:off + d])
            off += d
        return tuple(outs)


def reference_forward(model, x_nchw):
    """Pure-JAX reference matching the PyTorch semantics."""
    x_nhwc = jnp.transpose(x_nchw, (0, 2, 3, 1)).astype(jnp.float32)
    conv = lax.conv_general_dilated(
        x_nhwc, model.conv_w, window_strides=(1, 1), padding="SAME",
        dimension_numbers=("NHWC", "HWIO", "NHWC")) + model.conv_b
    conv = jnp.maximum(conv, 0.0)
    feats = conv.mean(axis=(1, 2))                       # pooled features (B, F)
    return tuple(feats @ w + b for (w, b) in model._heads())


if __name__ == "__main__":
    key = jax.random.PRNGKey(0)
    # Small shapes: batch=2, channels=4, spatial=16x16, num_features=32, num_classes=10
    x = jax.random.normal(key, (2, 4, 16, 16), jnp.float32)

    model = MultiTaskPallas(jax.random.PRNGKey(42), in_channels=4,
                            num_features=32, num_classes=10,
                            use_adv_classif=False, use_is_adv=True)

    outs = model(x)
    outs = jax.block_until_ready(outs)

    refs = reference_forward(model, x)
    for o, r in zip(outs, refs):
        np.testing.assert_allclose(np.asarray(o), np.asarray(r),
                                   rtol=1e-4, atol=1e-4)
    # (class_true, is_adv) == ((2, 10), (2, 2)) with default flags
    print("KERNEL_OK")
</pallas_src>

<mosaic_0001>
module attributes {stable_mosaic.version = 11 : i64} {
  func.func @kernel(%arg0: i32, %arg1: i32, %arg2: memref<1x1x184x4xf32, #tpu.memory_space<vmem>>, %arg3: memref<9x4x32xf32, #tpu.memory_space<vmem>>, %arg4: memref<1x32xf32, #tpu.memory_space<vmem>>, %arg5: memref<1x144xf32, #tpu.memory_space<vmem>>, %arg6: memref<32x128xf32, #tpu.memory_space<vmem>>, %arg7: memref<1x128xf32, #tpu.memory_space<vmem>>, %arg8: memref<1x1x128xf32, #tpu.memory_space<vmem>>, %arg9: memref<1x32xf32, #tpu.memory_space<vmem>>) attributes {dimension_semantics = [#tpu.dimension_semantics<parallel>, #tpu.dimension_semantics<arbitrary>], iteration_bounds = array<i64: 2, 2>, scalar_prefetch = 0 : i64, scratch_operands = 1 : i64, tpu.core_type = #tpu.core_type<tc>, window_params = [{transform_indices = @transform_0, window_bounds = array<i64: 1, 1, 184, 4>}, {pipeline_mode = #tpu.pipeline_mode<synchronous>, transform_indices = @transform_1, window_bounds = array<i64: 9, 4, 32>}, {pipeline_mode = #tpu.pipeline_mode<synchronous>, transform_indices = @transform_2, window_bounds = array<i64: 1, 32>}, {pipeline_mode = #tpu.pipeline_mode<synchronous>, transform_indices = @transform_3, window_bounds = array<i64: 1, 144>}, {pipeline_mode = #tpu.pipeline_mode<synchronous>, transform_indices = @transform_4, window_bounds = array<i64: 32, 128>}, {pipeline_mode = #tpu.pipeline_mode<synchronous>, transform_indices = @transform_5, window_bounds = array<i64: 1, 128>}, {transform_indices = @transform_6, window_bounds = array<i64: 1, 1, 128>}]} {
    %cst = arith.constant 0.000000e+00 : f32
    %0 = vector.broadcast %cst : f32 to vector<144x32xf32>
    %c0 = arith.constant 0 : index
    %c0_0 = arith.constant 0 : index
    %c0_1 = arith.constant 0 : index
    %c0_2 = arith.constant 0 : index
    %1 = vector.load %arg2[%c0, %c0_0, %c0_1, %c0_2] : memref<1x1x184x4xf32, #tpu.memory_space<vmem>>, vector<1x1x144x4xf32>
    %2 = vector.shape_cast %1 : vector<1x1x144x4xf32> to vector<144x4xf32>
    %c0_3 = arith.constant 0 : index
    %c0_4 = arith.constant 0 : index
    %c0_5 = arith.constant 0 : index
    %3 = vector.load %arg3[%c0_3, %c0_4, %c0_5] : memref<9x4x32xf32, #tpu.memory_space<vmem>>, vector<1x4x32xf32>
    %4 = vector.shape_cast %3 : vector<1x4x32xf32> to vector<4x32xf32>
    %cst_6 = arith.constant dense<0.000000e+00> : vector<144x32xf32>
    %5 = tpu.matmul %2, %4, %cst_6 {dimension_numbers = #tpu.dot_dimension_numbers<[1], [0], [0], [1], [0, 0, 1, 1], [], []>} : vector<144x4xf32>, vector<4x32xf32>, vector<144x32xf32> -> vector<144x32xf32>
    %6 = arith.addf %0, %5 : vector<144x32xf32>
    %c0_7 = arith.constant 0 : index
    %c0_8 = arith.constant 0 : index
    %c1 = arith.constant 1 : index
    %c0_9 = arith.constant 0 : index
    %7 = vector.load %arg2[%c0_7, %c0_8, %c1, %c0_9] : memref<1x1x184x4xf32, #tpu.memory_space<vmem>>, vector<1x1x144x4xf32>
    %8 = vector.shape_cast %7 : vector<1x1x144x4xf32> to vector<144x4xf32>
    %c1_10 = arith.constant 1 : index
    %c0_11 = arith.constant 0 : index
    %c0_12 = arith.constant 0 : index
    %9 = vector.load %arg3[%c1_10, %c0_11, %c0_12] : memref<9x4x32xf32, #tpu.memory_space<vmem>>, vector<1x4x32xf32>
    %10 = vector.shape_cast %9 : vector<1x4x32xf32> to vector<4x32xf32>
    %cst_13 = arith.constant dense<0.000000e+00> : vector<144x32xf32>
    %11 = tpu.matmul %8, %10, %cst_13 {dimension_numbers = #tpu.dot_dimension_numbers<[1], [0], [0], [1], [0, 0, 1, 1], [], []>} : vector<144x4xf32>, vector<4x32xf32>, vector<144x32xf32> -> vector<144x32xf32>
    %12 = arith.addf %6, %11 : vector<144x32xf32>
    %c0_14 = arith.constant 0 : index
    %c0_15 = arith.constant 0 : index
    %c2 = arith.constant 2 : index
    %c0_16 = arith.constant 0 : index
    %13 = vector.load %arg2[%c0_14, %c0_15, %c2, %c0_16] : memref<1x1x184x4xf32, #tpu.memory_space<vmem>>, vector<1x1x144x4xf32>
    %14 = vector.shape_cast %13 : vector<1x1x144x4xf32> to vector<144x4xf32>
    %c2_17 = arith.constant 2 : index
    %c0_18 = arith.constant 0 : index
    %c0_19 = arith.constant 0 : index
    %15 = vector.load %arg3[%c2_17, %c0_18, %c0_19] : memref<9x4x32xf32, #tpu.memory_space<vmem>>, vector<1x4x32xf32>
    %16 = vector.shape_cast %15 : vector<1x4x32xf32> to vector<4x32xf32>
    %cst_20 = arith.constant dense<0.000000e+00> : vector<144x32xf32>
    %17 = tpu.matmul %14, %16, %cst_20 {dimension_numbers = #tpu.dot_dimension_numbers<[1], [0], [0], [1], [0, 0, 1, 1], [], []>} : vector<144x4xf32>, vector<4x32xf32>, vector<144x32xf32> -> vector<144x32xf32>
    %18 = arith.addf %12, %17 : vector<144x32xf32>
    %c0_21 = arith.constant 0 : index
    %c0_22 = arith.constant 0 : index
    %c18 = arith.constant 18 : index
    %c0_23 = arith.constant 0 : index
    %19 = vector.load %arg2[%c0_21, %c0_22, %c18, %c0_23] : memref<1x1x184x4xf32, #tpu.memory_space<vmem>>, vector<1x1x144x4xf32>
    %20 = vector.shape_cast %19 : vector<1x1x144x4xf32> to vector<144x4xf32>
    %c3 = arith.constant 3 : index
    %c0_24 = arith.constant 0 : index
    %c0_25 = arith.constant 0 : index
    %21 = vector.load %arg3[%c3, %c0_24, %c0_25] : memref<9x4x32xf32, #tpu.memory_space<vmem>>, vector<1x4x32xf32>
    %22 = vector.shape_cast %21 : vector<1x4x32xf32> to vector<4x32xf32>
    %cst_26 = arith.constant dense<0.000000e+00> : vector<144x32xf32>
    %23 = tpu.matmul %20, %22, %cst_26 {dimension_numbers = #tpu.dot_dimension_numbers<[1], [0], [0], [1], [0, 0, 1, 1], [], []>} : vector<144x4xf32>, vector<4x32xf32>, vector<144x32xf32> -> vector<144x32xf32>
    %24 = arith.addf %18, %23 : vector<144x32xf32>
    %c0_27 = arith.constant 0 : index
    %c0_28 = arith.constant 0 : index
    %c19 = arith.constant 19 : index
    %c0_29 = arith.constant 0 : index
    %25 = vector.load %arg2[%c0_27, %c0_28, %c19, %c0_29] : memref<1x1x184x4xf32, #tpu.memory_space<vmem>>, vector<1x1x144x4xf32>
    %26 = vector.shape_cast %25 : vector<1x1x144x4xf32> to vector<144x4xf32>
    %c4 = arith.constant 4 : index
    %c0_30 = arith.constant 0 : index
    %c0_31 = arith.constant 0 : index
    %27 = vector.load %arg3[%c4, %c0_30, %c0_31] : memref<9x4x32xf32, #tpu.memory_space<vmem>>, vector<1x4x32xf32>
    %28 = vector.shape_cast %27 : vector<1x4x32xf32> to vector<4x32xf32>
    %cst_32 = arith.constant dense<0.000000e+00> : vector<144x32xf32>
    %29 = tpu.matmul %26, %28, %cst_32 {dimension_numbers = #tpu.dot_dimension_numbers<[1], [0], [0], [1], [0, 0, 1, 1], [], []>} : vector<144x4xf32>, vector<4x32xf32>, vector<144x32xf32> -> vector<144x32xf32>
    %30 = arith.addf %24, %29 : vector<144x32xf32>
    %c0_33 = arith.constant 0 : index
    %c0_34 = arith.constant 0 : index
    %c20 = arith.constant 20 : index
    %c0_35 = arith.constant 0 : index
    %31 = vector.load %arg2[%c0_33, %c0_34, %c20, %c0_35] : memref<1x1x184x4xf32, #tpu.memory_space<vmem>>, vector<1x1x144x4xf32>
    %32 = vector.shape_cast %31 : vector<1x1x144x4xf32> to vector<144x4xf32>
    %c5 = arith.constant 5 : index
    %c0_36 = arith.constant 0 : index
    %c0_37 = arith.constant 0 : index
    %33 = vector.load %arg3[%c5, %c0_36, %c0_37] : memref<9x4x32xf32, #tpu.memory_space<vmem>>, vector<1x4x32xf32>
    %34 = vector.shape_cast %33 : vector<1x4x32xf32> to vector<4x32xf32>
    %cst_38 = arith.constant dense<0.000000e+00> : vector<144x32xf32>
    %35 = tpu.matmul %32, %34, %cst_38 {dimension_numbers = #tpu.dot_dimension_numbers<[1], [0], [0], [1], [0, 0, 1, 1], [], []>} : vector<144x4xf32>, vector<4x32xf32>, vector<144x32xf32> -> vector<144x32xf32>
    %36 = arith.addf %30, %35 : vector<144x32xf32>
    %c0_39 = arith.constant 0 : index
    %c0_40 = arith.constant 0 : index
    %c36 = arith.constant 36 : index
    %c0_41 = arith.constant 0 : index
    %37 = vector.load %arg2[%c0_39, %c0_40, %c36, %c0_41] : memref<1x1x184x4xf32, #tpu.memory_space<vmem>>, vector<1x1x144x4xf32>
    %38 = vector.shape_cast %37 : vector<1x1x144x4xf32> to vector<144x4xf32>
    %c6 = arith.constant 6 : index
    %c0_42 = arith.constant 0 : index
    %c0_43 = arith.constant 0 : index
    %39 = vector.load %arg3[%c6, %c0_42, %c0_43] : memref<9x4x32xf32, #tpu.memory_space<vmem>>, vector<1x4x32xf32>
    %40 = vector.shape_cast %39 : vector<1x4x32xf32> to vector<4x32xf32>
    %cst_44 = arith.constant dense<0.000000e+00> : vector<144x32xf32>
    %41 = tpu.matmul %38, %40, %cst_44 {dimension_numbers = #tpu.dot_dimension_numbers<[1], [0], [0], [1], [0, 0, 1, 1], [], []>} : vector<144x4xf32>, vector<4x32xf32>, vector<144x32xf32> -> vector<144x32xf32>
    %42 = arith.addf %36, %41 : vector<144x32xf32>
    %c0_45 = arith.constant 0 : index
    %c0_46 = arith.constant 0 : index
    %c37 = arith.constant 37 : index
    %c0_47 = arith.constant 0 : index
    %43 = vector.load %arg2[%c0_45, %c0_46, %c37, %c0_47] : memref<1x1x184x4xf32, #tpu.memory_space<vmem>>, vector<1x1x144x4xf32>
    %44 = vector.shape_cast %43 : vector<1x1x144x4xf32> to vector<144x4xf32>
    %c7 = arith.constant 7 : index
    %c0_48 = arith.constant 0 : index
    %c0_49 = arith.constant 0 : index
    %45 = vector.load %arg3[%c7, %c0_48, %c0_49] : memref<9x4x32xf32, #tpu.memory_space<vmem>>, vector<1x4x32xf32>
    %46 = vector.shape_cast %45 : vector<1x4x32xf32> to vector<4x32xf32>
    %cst_50 = arith.constant dense<0.000000e+00> : vector<144x32xf32>
    %47 = tpu.matmul %44, %46, %cst_50 {dimension_numbers = #tpu.dot_dimension_numbers<[1], [0], [0], [1], [0, 0, 1, 1], [], []>} : vector<144x4xf32>, vector<4x32xf32>, vector<144x32xf32> -> vector<144x32xf32>
    %48 = arith.addf %42, %47 : vector<144x32xf32>
    %c0_51 = arith.constant 0 : index
    %c0_52 = arith.constant 0 : index
    %c38 = arith.constant 38 : index
    %c0_53 = arith.constant 0 : index
    %49 = vector.load %arg2[%c0_51, %c0_52, %c38, %c0_53] : memref<1x1x184x4xf32, #tpu.memory_space<vmem>>, vector<1x1x144x4xf32>
    %50 = vector.shape_cast %49 : vector<1x1x144x4xf32> to vector<144x4xf32>
    %c8 = arith.constant 8 : index
    %c0_54 = arith.constant 0 : index
    %c0_55 = arith.constant 0 : index
    %51 = vector.load %arg3[%c8, %c0_54, %c0_55] : memref<9x4x32xf32, #tpu.memory_space<vmem>>, vector<1x4x32xf32>
    %52 = vector.shape_cast %51 : vector<1x4x32xf32> to vector<4x32xf32>
    %cst_56 = arith.constant dense<0.000000e+00> : vector<144x32xf32>
    %53 = tpu.matmul %50, %52, %cst_56 {dimension_numbers = #tpu.dot_dimension_numbers<[1], [0], [0], [1], [0, 0, 1, 1], [], []>} : vector<144x4xf32>, vector<4x32xf32>, vector<144x32xf32> -> vector<144x32xf32>
    %54 = arith.addf %48, %53 : vector<144x32xf32>
    %c0_57 = arith.constant 0 : index
    %c0_58 = arith.constant 0 : index
    %55 = vector.load %arg4[%c0_57, %c0_58] : memref<1x32xf32, #tpu.memory_space<vmem>>, vector<1x32xf32>
    %56 = vector.broadcast %55 : vector<1x32xf32> to vector<144x32xf32>
    %57 = arith.addf %54, %56 : vector<144x32xf32>
    %cst_59 = arith.constant 0.000000e+00 : f32
    %58 = vector.broadcast %cst_59 : f32 to vector<144x32xf32>
    %59 = arith.maximumf %57, %58 : vector<144x32xf32>
    %c0_60 = arith.constant 0 : index
    %c0_61 = arith.constant 0 : index
    %60 = vector.load %arg5[%c0_60, %c0_61] : memref<1x144xf32, #tpu.memory_space<vmem>>, vector<1x144xf32>
    %cst_62 = arith.constant dense<0.000000e+00> : vector<1x32xf32>
    %61 = tpu.matmul %60, %59, %cst_62 {dimension_numbers = #tpu.dot_dimension_numbers<[1], [0], [0], [1], [0, 0, 1, 1], [], []>} : vector<1x144xf32>, vector<144x32xf32>, vector<1x32xf32> -> vector<1x32xf32>
    %c0_i32 = arith.constant 0 : i32
    %62 = arith.cmpi eq, %arg1, %c0_i32 : i32
    %63 = arith.extui %62 : i1 to i32
    %c0_i32_63 = arith.constant 0 : i32
    %64 = arith.cmpi ne, %63, %c0_i32_63 : i32
    scf.if %64 {
      %cst_69 = arith.constant 0.000000e+00 : f32
      %71 = vector.broadcast %cst_69 : f32 to vector<1x32xf32>
      %c0_70 = arith.constant 0 : index
      %c0_71 = arith.constant 0 : index
      %72 = vector.load %arg9[%c0_70, %c0_71] : memref<1x32xf32, #tpu.memory_space<vmem>>, vector<1x32xf32>
      tpu.vector_store %arg9[%c0_70, %c0_71], %71 {strides = array<i32>} : memref<1x32xf32, #tpu.memory_space<vmem>>, vector<1x32xf32>,
    } else {
    }
    %c0_64 = arith.constant 0 : index
    %c0_65 = arith.constant 0 : index
    %65 = vector.load %arg9[%c0_64, %c0_65] : memref<1x32xf32, #tpu.memory_space<vmem>>, vector<1x32xf32>
    %66 = arith.addf %65, %61 : vector<1x32xf32>
    %c0_66 = arith.constant 0 : index
    %c0_67 = arith.constant 0 : index
    %67 = vector.load %arg9[%c0_66, %c0_67] : memref<1x32xf32, #tpu.memory_space<vmem>>, vector<1x32xf32>
    tpu.vector_store %arg9[%c0_66, %c0_67], %66 {strides = array<i32>} : memref<1x32xf32, #tpu.memory_space<vmem>>, vector<1x32xf32>,
    %c1_i32 = arith.constant 1 : i32
    %68 = arith.cmpi eq, %arg1, %c1_i32 : i32
    %69 = arith.extui %68 : i1 to i32
    %c0_i32_68 = arith.constant 0 : i32
    %70 = arith.cmpi ne, %69, %c0_i32_68 : i32
    scf.if %70 {
      %c0_69 = arith.constant 0 : index
      %c0_70 = arith.constant 0 : index
      %71 = vector.load %arg9[%c0_69, %c0_70] : memref<1x32xf32, #tpu.memory_space<vmem>>, vector<1x32xf32>
      %c0_71 = arith.constant 0 : index
      %c0_72 = arith.constant 0 : index
      %72 = vector.load %arg6[%c0_71, %c0_72] : memref<32x128xf32, #tpu.memory_space<vmem>>, vector<32x128xf32>
      %cst_73 = arith.constant dense<0.000000e+00> : vector<1x128xf32>
      %73 = tpu.matmul %71, %72, %cst_73 {dimension_numbers = #tpu.dot_dimension_numbers<[1], [0], [0], [1], [0, 0, 1, 1], [], []>} : vector<1x32xf32>, vector<32x128xf32>, vector<1x128xf32> -> vector<1x128xf32>
      %c0_74 = arith.constant 0 : index
      %c0_75 = arith.constant 0 : index
      %74 = vector.load %arg7[%c0_74, %c0_75] : memref<1x128xf32, #tpu.memory_space<vmem>>, vector<1x128xf32>
      %75 = arith.addf %73, %74 : vector<1x128xf32>
      %c0_76 = arith.constant 0 : index
      %c0_77 = arith.constant 0 : index
      %c0_78 = arith.constant 0 : index
      %76 = vector.load %arg8[%c0_76, %c0_77, %c0_78] : memref<1x1x128xf32, #tpu.memory_space<vmem>>, vector<1x1x128xf32>
      %77 = vector.shape_cast %76 : vector<1x1x128xf32> to vector<1x128xf32>
      %78 = vector.shape_cast %75 : vector<1x128xf32> to vector<1x1x128xf32>
      tpu.vector_store %arg8[%c0_76, %c0_77, %c0_78], %78 {strides = array<i32>} : memref<1x1x128xf32, #tpu.memory_space<vmem>>, vector<1x1x128xf32>,
    } else {
    }
    return
  }
  func.func @transform_0(%arg0: i32, %arg1: i32) -> (i32, i32, i32, i32) {
    %c0_i32 = arith.constant 0 : i32
    %c0_i32_0 = arith.constant 0 : i32
    %c0_i32_1 = arith.constant 0 : i32
    return %arg0, %arg1, %c0_i32, %c0_i32_0 : i32, i32, i32, i32
  }
  func.func @transform_1(%arg0: i32, %arg1: i32) -> (i32, i32, i32) {
    %c0_i32 = arith.constant 0 : i32
    %c0_i32_0 = arith.constant 0 : i32
    %c0_i32_1 = arith.constant 0 : i32
    %c0_i32_2 = arith.constant 0 : i32
    return %c0_i32, %c0_i32_0, %c0_i32_1 : i32, i32, i32
  }
  func.func @transform_2(%arg0: i32, %arg1: i32) -> (i32, i32) {
    %c0_i32 = arith.constant 0 : i32
    %c0_i32_0 = arith.constant 0 : i32
    %c0_i32_1 = arith.constant 0 : i32
    return %c0_i32, %c0_i32_0 : i32, i32
  }
  func.func @transform_3(%arg0: i32, %arg1: i32) -> (i32, i32) {
    %c0_i32 = arith.constant 0 : i32
    %c0_i32_0 = arith.constant 0 : i32
    %c0_i32_1 = arith.constant 0 : i32
    return %c0_i32, %c0_i32_0 : i32, i32
  }
  func.func @transform_4(%arg0: i32, %arg1: i32) -> (i32, i32) {
    %c0_i32 = arith.constant 0 : i32
    %c0_i32_0 = arith.constant 0 : i32
    %c0_i32_1 = arith.constant 0 : i32
    return %c0_i32, %c0_i32_0 : i32, i32
  }
  func.func @transform_5(%arg0: i32, %arg1: i32) -> (i32, i32) {
    %c0_i32 = arith.constant 0 : i32
    %c0_i32_0 = arith.constant 0 : i32
    %c0_i32_1 = arith.constant 0 : i32
    return %c0_i32, %c0_i32_0 : i32, i32
  }
  func.func @transform_6(%arg0: i32, %arg1: i32) -> (i32, i32, i32) {
    %c0_i32 = arith.constant 0 : i32
    %c0_i32_0 = arith.constant 0 : i32
    %c0_i32_1 = arith.constant 0 : i32
    return %arg0, %c0_i32, %c0_i32_0 : i32, i32, i32
  }
}

</mosaic_0001>

<bundles_post_ra>
// kernel: tpu_custom_call.1
= control target key start
LH: loop header
LB: loop body
LE: loop exit
PB: predicated region body
PF: predicated region fallthrough
CT: control target
= control target key end

     0   :  { %11 = vsyncpa [#allocation4], 0  ;;  %s4433_s0 = inlined_call_operand.vmem [shape: f32[2,2,184,4], index: 0, kind: input, shape index: {}]   ;;  %s4434_s1 = inlined_call_operand.vmem [shape: f32[9,4,32], index: 1, kind: input, shape index: {}]   ;;  %s4435_s2 = inlined_call_operand.vmem [shape: f32[1,32], index: 2, kind: input, shape index: {}]   ;;  %s4436_s3 = inlined_call_operand.vmem [shape: f32[1,144], index: 3, kind: input, shape index: {}]   ;;  %s4437_s4 = inlined_call_operand.vmem [shape: f32[32,128], index: 4, kind: input, shape index: {}]   ;;  %s4438_s5 = inlined_call_operand.vmem [shape: f32[1,128], index: 5, kind: input, shape index: {}]   ;;  %s4439_s6 = inlined_call_operand.hbm [shape: f32[2,1,128], index: 6, kind: output, shape index: {}]  }
   0x1   :  { %13 = vsyncpa [#allocation4 + $0x1], 0  ;;  %s3833_s21 = smov 0   ;;  %s3835_s22 = smov 0  }
   0x2   :  { %s3837_s23 = smov 0   ;;  %s3839_s24 = smov 0  }
   0x3   :  { %s3841_s25 = smov 0   ;;  %s3843_s26 = smov 0  }
   0x4   :  { %s3845_s27 = smov 0   ;;  %s3847_s28 = smov 0  }
   0x5 LB: > { %s2800_s29 = sadd.s32 4294967295, %s3790_s28   ;;  %s2801_s30 = sadd.s32 4294967294, %s3790_s28   ;;  %s3790_s28 = sphi %s3847_s28, %s19_s28   ;;  %s3786_s27 = sphi %s3845_s27, %s4450_s27   ;;  %s3782_s26 = sphi %s3843_s26, %s4449_s26   ;;  %s3778_s25 = sphi %s3841_s25, %s4448_s25   ;;  %s3774_s24 = sphi %s3839_s24, %s4447_s24   ;;  %s3770_s23 = sphi %s3837_s23, %s4446_s23   ;;  %s3766_s22 = sphi %s3835_s22, %s4445_s22   ;;  %s3762_s21 = sphi %s3833_s21, %s4444_s21  }
   0x6   : > { %s28_s7 = sadd.s32 1, %s3782_s26  ;;  %s31_s8 = sadd.s32 1, %s3786_s27 }
   0x7   : > { %p29_p0 = scmp.ge.s32.totalorder %s28_s7, 2  ;;  %p181_p1 = scmp.ne.s32.totalorder %s3770_s23, %s3766_s22 }
   0x8   : > { %p182_p2 = scmp.eq.s32.totalorder %s2800_s29, 3  ;;  %p187_p4 = scmp.ne.s32.totalorder %s3766_s22, %s3762_s21 }
   0x9   : > { %s4452_s7 = smov (%p29_p0, %s28_s7), 0  ;;  %s4454_s8 = smov (!%p29_p0, %s31_s8), %s3786_s27 }
   0xa   : > { %p3882_p3 = por %p182_p2, %p181_p1  ;;  %p33_p5 = scmp.ge.s32.totalorder %s4454_s8, 2 }
   0xb   : > { %p188_p6 = scmp.eq.s32.totalorder %s2801_s30, 3  ;;  %p2804_p7 = scmp.ge.s32.totalorder %s3790_s28, 1 }
   0xc   : > { %p233_p8 = scmp.lt.s32.totalorder %s3790_s28, 5  ;;  %s4456_s8 = smov (%p33_p5, %s4454_s8), 0 }
   0xd   : > { %p3892_p9 = por %p188_p6, %p187_p4  ;;  %s168_s11 = ssub.s32 %s3786_s27, %s4456_s8 }
   0xe   : > { %p234_p10 = pnand %p2804_p7, %p233_p8  ;;  %s171_s12 = sadd.s32 1, %s3770_s23 }
   0xf   : > { %p169_p11 = scmp.eq.s32.totalorder %s168_s11, 0  ;;  %v2806_v0 = vld [vmem:[%s4434_s1 + $0x4] sm:$0xf] (!%p234_p10)  ;;  %vm369_vm0 = vcmask (!%p234_p10), 1043456   ;;  %v2885_v1 = vld [vmem:[%s4434_s1 + $0x10] sm:$0xf] (!%p234_p10) }
  0x10   : > { %237 = sbr.rel (%p234_p10) target bundleno = 897 (0x381), region = 44  ;;  %3169 = vmatprep.subr.msk.mxu1 (!%p234_p10), %vm369_vm0, %v2806_v0  ;;  %3285 = vmatprep.subr.msk.mxu0 (!%p234_p10), %vm369_vm0, %v2885_v1  ;;  %p266_p12 = scmp.lt.s32.totalorder (!%p234_p10), %s3778_s25, 1  ;;  %v2905_v2 = vld [vmem:[%s4434_s1 + $0x14] sm:$0xf] (!%p234_p10)  ;;  %v293_v3 = vld [vmem:[%s4434_s1] sm:$0xf] (!%p234_p10) }
  0x11   : > { %s3900_s13 = scalar_select %p169_p11, %s3770_s23, %s171_s12  }
  0x12   : > { %3170 = vmatpush3.msk.msra.mxu1 (!%p234_p10), %vm369_vm0, %v2806_v0  ;;  %p268_p13 = scmp.lt.s32.totalorder (!%p234_p10), %s3774_s24, 1  ;;  %3286 = vmatpush3.msk.msra.mxu0 (!%p234_p10), %vm369_vm0, %v2885_v1  ;;  %vm314_vm1 = vcmask (!%p234_p10), 31744   ;;  %v3943_v10 = vld [vmem:[%s4434_s1 + $0x18] sm:$0xf] (!%p234_p10)  ;;  %v3948_v11 = vld [vmem:[%s4434_s1 + $0x8] sm:$0xf] (!%p234_p10) }
  0x13   : > { %3314 = vmatprep.subr.msk.mxu0 (!%p234_p10), %vm369_vm0, %v2905_v2  ;;  %3198 = vmatprep.subr.msk.mxu1 (!%p234_p10), %vm369_vm0, %v293_v3  ;;  %v4033_v48 = vld [vmem:[%s4434_s1 + $0x1c] sm:$0xf] (!%p234_p10)  ;;  %v4038_v49 = vld [vmem:[%s4434_s1 + $0xc] sm:$0xf] (!%p234_p10)  ;;  %vm2544_vm2 = vcmask (!%p234_p10), 130048   ;;  %p2987_p0 = scmp.ne.s32.totalorder (!%p234_p10), %s3774_s24, 0 }
  0x17   : > { %s267_s11 = scalar_select %p266_p12, %s3778_s25, 1 }
  0x18   : > { %s269_s12 = scalar_select %p268_p13, %s3774_s24, 1 }
  0x19   : > { %s3619_s15 = smul.u32 46, %s267_s11  ;;  %vm2621_vm3 = vcmask (!%p2987_p0), 253952  }
  0x1a   : > { %s3618_s16 = smul.u32 23, %s269_s12  ;;  %s4442_s12 = sand.u32 1, %s3766_s22  }
  0x1c   : > { %s272_s17 = sadd.s32 %s3619_s15, %s3618_s16  ;;  %s4359_s15 = scalar_lea.vmem [#allocation3], %s4442_s12 }
  0x1d   : > { %s2805_s18 = sshll.u32 %s272_s17, 3 }
  0x1e   : > { %s3928_s14 = scalar_lea.vmem %s4433_s0, %s2805_s18 }
  0x1f   : > { %v294_v4 = vld [vmem:[%s3928_s14 + $0x1] sm:$0xff]  ;;  %v1240_v5 = vld [vmem:[%s3928_s14 + $0x13] sm:$0xff]  ;;  %v295_v6 = vld [vmem:[%s3928_s14 + $0x9] sm:$0xff] }
  0x20   : > { %3171 = vmatprep.mubr.msk.f32.mxu1 %vm314_vm1, %v294_v4  ;;  %3287 = vmatprep.mubr.msk.f32.mxu0 %vm314_vm1, %v1240_v5  ;;  %v1241_v7 = vld [vmem:[%s3928_s14 + $0x1b] sm:$0xff]  ;;  %v296_v8 = vld [vmem:[%s3928_s14 + $0x11] sm:$0xff]  ;;  %v1242_v9 = vld [vmem:[%s3928_s14 + $0x23] sm:$0xff] }
  0x21   : > { %3172 = vmatmul.mubr.msk.f32.vlgmr.msra.gmra.mrb[0].mxu1 %vm314_vm1, %v295_v6  ;;  %3288 = vmatmul.mubr.msk.f32.vlgmr.msra.gmra.mrb[0].mxu0 %vm314_vm1, %v1241_v7  ;;  %v297_v12 = vld [vmem:[%s3928_s14 + $0x19] sm:$0xff]  ;;  %v1243_v13 = vld [vmem:[%s3928_s14 + $0x2b] sm:$0xff]  ;;  %v298_v14 = vld [vmem:[%s3928_s14 + $0x21] sm:$0xff] }
  0x22   : > { %3315 = vmatpush3.msk.msra.mxu0 %vm369_vm0, %v2905_v2  ;;  %3174 = vmatprep.mubr.msk.f32.mxu1 %vm314_vm1, %v296_v8  ;;  %v1244_v15 = vld [vmem:[%s3928_s14 + $0x33] sm:$0xff]  ;;  %v299_v16 = vld [vmem:[%s3928_s14 + $0x29] sm:$0xff]  ;;  %v1245_v17 = vld [vmem:[%s3928_s14 + $0x3b] sm:$0xff] }
  0x23   : > { %3290 = vmatprep.mubr.msk.f32.mxu0 %vm314_vm1, %v1242_v9  ;;  %3199 = vmatpush3.msk.msra.mxu1 %vm369_vm0, %v293_v3  ;;  %v300_v18 = vld [vmem:[%s3928_s14 + $0x31] sm:$0xff]  ;;  %v1246_v19 = vld [vmem:[%s3928_s14 + $0x43] sm:$0xff]  ;;  %v301_v20 = vld [vmem:[%s3928_s14 + $0x39] sm:$0xff] }
  0x24   : > { %3343 = vmatprep.subr.msk.mxu0 %vm369_vm0, %v3943_v10  ;;  %3227 = vmatprep.subr.msk.mxu1 %vm369_vm0, %v3948_v11  ;;  %v1247_v21 = vld [vmem:[%s3928_s14 + $0x4b] sm:$0xff]  ;;  %v302_v22 = vld [vmem:[%s3928_s14 + $0x41] sm:$0xff]  ;;  %v1248_v23 = vld [vmem:[%s3928_s14 + $0x53] sm:$0xff] }
  0x25   : > { %3175 = vmatmul.mubr.msk.f32.gmra.mrb[2].mxu1 %vm314_vm1, %v297_v12  ;;  %3291 = vmatmul.mubr.msk.f32.gmra.mrb[2].mxu0 %vm314_vm1, %v1243_v13  ;;  %v303_v24 = vld [vmem:[%s3928_s14 + $0x49] sm:$0xff]  ;;  %v1249_v25 = vld [vmem:[%s3928_s14 + $0x5b] sm:$0xff]  ;;  %v304_v26 = vld [vmem:[%s3928_s14 + $0x51] sm:$0xff] }
  0x26   : > { %3177 = vmatprep.mubr.msk.f32.mxu1 %vm314_vm1, %v298_v14  ;;  %3293 = vmatprep.mubr.msk.f32.mxu0 %vm314_vm1, %v1244_v15  ;;  %v1250_v27 = vld [vmem:[%s3928_s14 + $0x63] sm:$0xff]  ;;  %v305_v28 = vld [vmem:[%s3928_s14 + $0x59] sm:$0xff]  ;;  %v1251_v29 = vld [vmem:[%s3928_s14 + $0x6b] sm:$0xff] }
  0x27   : > { %v306_v30 = vld [vmem:[%s3928_s14 + $0x61] sm:$0xff]  ;;  %v1252_v31 = vld [vmem:[%s3928_s14 + $0x73] sm:$0xff]  ;;  %v307_v32 = vld [vmem:[%s3928_s14 + $0x69] sm:$0xff] }
  0x28   : > { %v1253_v33 = vld [vmem:[%s3928_s14 + $0x7b] sm:$0xff]  ;;  %v308_v34 = vld [vmem:[%s3928_s14 + $0x71] sm:$0xff]  ;;  %v1254_v35 = vld [vmem:[%s3928_s14 + $0x83] sm:$0xff] }
  0x29   : > { %3178 = vmatmul.mubr.msk.f32.gmra.mrb[4].mxu1 %vm314_vm1, %v299_v16  ;;  %3294 = vmatmul.mubr.msk.f32.gmra.mrb[4].mxu0 %vm314_vm1, %v1245_v17  ;;  %v309_v36 = vld [vmem:[%s3928_s14 + $0x79] sm:$0xff]  ;;  %v1255_v37 = vld [vmem:[%s3928_s14 + $0x8b] sm:$0xff]  ;;  %v310_v38 = vld [vmem:[%s3928_s14 + $0x81] sm:$0xff] }
  0x2a   : > { %3180 = vmatprep.mubr.msk.f32.mxu1 %vm314_vm1, %v300_v18  ;;  %3296 = vmatprep.mubr.msk.f32.mxu0 %vm314_vm1, %v1246_v19  ;;  %v1256_v39 = vld [vmem:[%s3928_s14 + $0x93] sm:$0xff]  ;;  %v311_v40 = vld [vmem:[%s3928_s14 + $0x89] sm:$0xff]  ;;  %v1257_v41 = vld [vmem:[%s3928_s14 + $0x9b] sm:$0xff] }
  0x2b   : > { %v275_v42 = vld [vmem:[%s3928_s14] sm:$0xff]  ;;  %v1490_v43 = vld [vmem:[%s3928_s14 + $0x14] sm:$0xff]  ;;  %v276_v44 = vld [vmem:[%s3928_s14 + $0x8] sm:$0xff] }
  0x2c   : > { %v1491_v45 = vld [vmem:[%s3928_s14 + $0x1c] sm:$0xff]  ;;  %v277_v46 = vld [vmem:[%s3928_s14 + $0x10] sm:$0xff]  ;;  %v4026_v47 = vld [vmem:[%s3928_s14 + $0x24] sm:$0xff] }
  0x2d   : > { %3181 = vmatmul.mubr.msk.f32.gmra.mrb[6].mxu1 %vm314_vm1, %v301_v20  ;;  %3297 = vmatmul.mubr.msk.f32.gmra.mrb[6].mxu0 %vm314_vm1, %v1247_v21  ;;  %v278_v50 = vld [vmem:[%s3928_s14 + $0x18] sm:$0xff]  ;;  %v4045_v51 = vld [vmem:[%s3928_s14 + $0x2c] sm:$0xff]  ;;  %v279_v52 = vld [vmem:[%s3928_s14 + $0x20] sm:$0xff] }
  0x2e   : > { %3183 = vmatprep.mubr.msk.f32.mxu1 %vm314_vm1, %v302_v22  ;;  %3299 = vmatprep.mubr.msk.f32.mxu0 %vm314_vm1, %v1248_v23  ;;  %v4051_v53 = vld [vmem:[%s3928_s14 + $0x34] sm:$0xff]  ;;  %v280_v54 = vld [vmem:[%s3928_s14 + $0x28] sm:$0xff]  ;;  %v4067_v55 = vld [vmem:[%s3928_s14 + $0x3c] sm:$0xff] }
  0x2f   : > { %v281_v56 = vld [vmem:[%s3928_s14 + $0x30] sm:$0xff]  ;;  %v4071_v57 = vld [vmem:[%s3928_s14 + $0x44] sm:$0xff]  ;;  %v282_v58 = vld [vmem:[%s3928_s14 + $0x38] sm:$0xff] }
  0x30   : > { %v4081_v59 = vld [vmem:[%s3928_s14 + $0x4c] sm:$0xff]  ;;  %v283_v60 = vld [vmem:[%s3928_s14 + $0x40] sm:$0xff]  ;;  %v4085_v61 = vld [vmem:[%s3928_s14 + $0x54] sm:$0xff] }
  0x31   : > { %3184 = vmatmul.mubr.msk.f32.gmra.mrb[8].mxu1 %vm314_vm1, %v303_v24  ;;  %3300 = vmatmul.mubr.msk.f32.gmra.mrb[8].mxu0 %vm314_vm1, %v1249_v25  ;;  %v284_v62 = vld [vmem:[%s3928_s14 + $0x48] sm:$0xff]  ;;  %v4095_v63 = vld [vmem:[%s3928_s14 + $0x5c] sm:$0xff]  ;;  %v285_v0 = vld [vmem:[%s3928_s14 + $0x50] sm:$0xff] }
  0x32   : > { %3186 = vmatprep.mubr.msk.f32.mxu1 %vm314_vm1, %v304_v26  ;;  %3302 = vmatprep.mubr.msk.f32.mxu0 %vm314_vm1, %v1250_v27  ;;  %v4099_v1 = vld [vmem:[%s3928_s14 + $0x64] sm:$0xff]  ;;  %v286_v2 = vld [vmem:[%s3928_s14 + $0x58] sm:$0xff]  ;;  %v1501_v3 = vld [vmem:[%s3928_s14 + $0x6c] sm:$0xff] }
  0x33   : > { %v287_v4 = vld [vmem:[%s3928_s14 + $0x60] sm:$0xff]  ;;  %v1502_v5 = vld [vmem:[%s3928_s14 + $0x74] sm:$0xff]  ;;  %v288_v6 = vld [vmem:[%s3928_s14 + $0x68] sm:$0xff] }
  0x34   : > { %v1503_v7 = vld [vmem:[%s3928_s14 + $0x7c] sm:$0xff]  ;;  %v289_v8 = vld [vmem:[%s3928_s14 + $0x70] sm:$0xff]  ;;  %v1504_v9 = vld [vmem:[%s3928_s14 + $0x84] sm:$0xff] }
  0x35   : > { %3187 = vmatmul.mubr.msk.f32.gmra.mrb[10].mxu1 %vm314_vm1, %v305_v28  ;;  %3303 = vmatmul.mubr.msk.f32.gmra.mrb[10].mxu0 %vm314_vm1, %v1251_v29  ;;  %v291_v12 = vld [vmem:[%s3928_s14 + $0x80] sm:$0xff]  ;;  %v1506_v13 = vld [vmem:[%s3928_s14 + $0x94] sm:$0xff]  ;;  %v292_v14 = vld [vmem:[%s3928_s14 + $0x88] sm:$0xff] }
  0x36   : > { %3189 = vmatprep.mubr.msk.f32.mxu1 %vm314_vm1, %v306_v30  ;;  %3305 = vmatprep.mubr.msk.f32.mxu0 %vm314_vm1, %v1252_v31  ;;  %v1507_v15 = vld [vmem:[%s3928_s14 + $0x9c] sm:$0xff]  ;;  %v741_v17 = vld [vmem:[%s3928_s14 + $0xa] sm:$0xff]  ;;  %v742_v18 = vld [vmem:[%s3928_s14 + $0x12] sm:$0xff] }
  0x37   : > { %v740_v16 = vld [vmem:[%s3928_s14 + $0x2] sm:$0xff]  ;;  %v743_v20 = vld [vmem:[%s3928_s14 + $0x1a] sm:$0xff]  ;;  %v745_v22 = vld [vmem:[%s3928_s14 + $0x2a] sm:$0xff] }
  0x38   : > { %v2965_v19 = vld [vmem:[%s4434_s1 + $0x20] sm:$0xf]  ;;  %v746_v23 = vld [vmem:[%s3928_s14 + $0x32] sm:$0xff]  ;;  %v749_v26 = vld [vmem:[%s3928_s14 + $0x4a] sm:$0xff] }
  0x39   : > { %3190 = vmatmul.mubr.msk.f32.gmra.mrb[12].mxu1 %vm314_vm1, %v307_v32  ;;  %3306 = vmatmul.mubr.msk.f32.gmra.mrb[12].mxu0 %vm314_vm1, %v1253_v33  ;;  %v744_v21 = vld [vmem:[%s3928_s14 + $0x22] sm:$0xff]  ;;  %v747_v24 = vld [vmem:[%s3928_s14 + $0x3a] sm:$0xff]  ;;  %v750_v27 = vld [vmem:[%s3928_s14 + $0x52] sm:$0xff] }
  0x3a   : > { %3192 = vmatprep.mubr.msk.f32.mxu1 %vm314_vm1, %v308_v34  ;;  %3308 = vmatprep.mubr.msk.f32.mxu0 %vm314_vm1, %v1254_v35  ;;  %v748_v25 = vld [vmem:[%s3928_s14 + $0x42] sm:$0xff]  ;;  %v751_v28 = vld [vmem:[%s3928_s14 + $0x5a] sm:$0xff]  ;;  %v753_v30 = vld [vmem:[%s3928_s14 + $0x6a] sm:$0xff] }
  0x3b   : > { %v752_v29 = vld [vmem:[%s3928_s14 + $0x62] sm:$0xff]  ;;  %v754_v31 = vld [vmem:[%s3928_s14 + $0x72] sm:$0xff]  ;;  %v755_v32 = vld [vmem:[%s3928_s14 + $0x7a] sm:$0xff] }
  0x3c   : > { %v756_v33 = vld [vmem:[%s3928_s14 + $0x82] sm:$0xff]  ;;  %v757_v35 = vld [vmem:[%s3928_s14 + $0x8a] sm:$0xff] }
  0x3d   : > { %3193 = vmatmul.mubr.msk.f32.gmra.mrb[14].mxu1 %vm314_vm1, %v309_v36  ;;  %3309 = vmatmul.mubr.msk.f32.gmra.mrb[14].mxu0 %vm314_vm1, %v1255_v37  ;;  %v1756_v34 = vld [vmem:[%s3928_s14 + $0xa4] sm:$0xff]  ;;  %v1757_v36 = vld [vmem:[%s3928_s14 + $0xac] sm:$0xff] }
  0x3e   : > { %3195 = vmatprep.mubr.msk.f32.mxu1 %vm314_vm1, %v310_v38  ;;  %3311 = vmatprep.mubr.msk.f32.mxu0 %vm314_vm1, %v1256_v39  ;;  %v1990_v37 = vld [vmem:[%s3928_s14 + $0x25] sm:$0xff]  ;;  %v1991_v38 = vld [vmem:[%s3928_s14 + $0x2d] sm:$0xff]  ;;  %v1992_v39 = vld [vmem:[%s3928_s14 + $0x35] sm:$0xff] }
  0x41   : > { %3196 = vmatmul.mubr.msk.f32.gmra.mrb[16].mxu1 %vm314_vm1, %v311_v40  ;;  %3312 = vmatmul.mubr.msk.f32.gmra.mrb[16].mxu0 %vm314_vm1, %v1257_v41  ;;  %v1993_v40 = vld [vmem:[%s3928_s14 + $0x3d] sm:$0xff]  ;;  %v1994_v41 = vld [vmem:[%s3928_s14 + $0x45] sm:$0xff] }
  0x42   : > { %3200 = vmatprep.mubr.msk.f32.mxu1 %vm314_vm1, %v275_v42  ;;  %3316 = vmatprep.mubr.msk.f32.mxu0 %vm314_vm1, %v1490_v43  ;;  %v1995_v42 = vld [vmem:[%s3928_s14 + $0x4d] sm:$0xff]  ;;  %v1996_v43 = vld [vmem:[%s3928_s14 + $0x55] sm:$0xff] }
  0x45   : > { %3201 = vmatmul.mubr.msk.f32.vlgmr.msra.gmra.mrb[0].mxu1 %vm314_vm1, %v276_v44  ;;  %3317 = vmatmul.mubr.msk.f32.vlgmr.msra.gmra.mrb[0].mxu0 %vm314_vm1, %v1491_v45  ;;  %v1997_v44 = vld [vmem:[%s3928_s14 + $0x5d] sm:$0xff]  ;;  %v1998_v45 = vld [vmem:[%s3928_s14 + $0x65] sm:$0xff] }
  0x46   : > { %3344 = vmatpush3.msk.msra.mxu0 %vm369_vm0, %v3943_v10  ;;  %3203 = vmatprep.mubr.msk.f32.mxu1 %vm314_vm1, %v277_v46  ;;  %v290_v10 = vld [vmem:[%s3928_s14 + $0x78] sm:$0xff]  ;;  %v1999_v46 = vld [vmem:[%s3928_s14 + $0x6d] sm:$0xff] }
  0x47   : > { %3319 = vmatprep.mubr.msk.f32.mxu0 %vm314_vm1, %v4026_v47  ;;  %3228 = vmatpush3.msk.msra.mxu1 %vm369_vm0, %v3948_v11  ;;  %v1505_v11 = vld [vmem:[%s3928_s14 + $0x8c] sm:$0xff] }
  0x48   : > { %3372 = vmatprep.subr.msk.mxu0 %vm369_vm0, %v4033_v48  ;;  %3256 = vmatprep.subr.msk.mxu1 %vm369_vm0, %v4038_v49 }
  0x49   : > { %3204 = vmatmul.mubr.msk.f32.gmra.mrb[2].mxu1 %vm314_vm1, %v278_v50  ;;  %3320 = vmatmul.mubr.msk.f32.gmra.mrb[2].mxu0 %vm314_vm1, %v4045_v51  ;;  %v2003_v50 = vld [vmem:[%s3928_s14 + $0x8d] sm:$0xff] }
  0x4a   : > { %3206 = vmatprep.mubr.msk.f32.mxu1 %vm314_vm1, %v279_v52  ;;  %3322 = vmatprep.mubr.msk.f32.mxu0 %vm314_vm1, %v4051_v53  ;;  %v2005_v52 = vld [vmem:[%s3928_s14 + $0x9d] sm:$0xff] }
  0x4d   : > { %3207 = vmatmul.mubr.msk.f32.gmra.mrb[4].mxu1 %vm314_vm1, %v280_v54  ;;  %3323 = vmatmul.mubr.msk.f32.gmra.mrb[4].mxu0 %vm314_vm1, %v4067_v55  ;;  %v2006_v54 = vld [vmem:[%s3928_s14 + $0xa5] sm:$0xff] }
  0x4e   : > { %3209 = vmatprep.mubr.msk.f32.mxu1 %vm314_vm1, %v281_v56  ;;  %3325 = vmatprep.mubr.msk.f32.mxu0 %vm314_vm1, %v4071_v57  ;;  %v2007_v56 = vld [vmem:[%s3928_s14 + $0xad] sm:$0xff] }
  0x51   : > { %3210 = vmatmul.mubr.msk.f32.gmra.mrb[6].mxu1 %vm314_vm1, %v282_v58  ;;  %3326 = vmatmul.mubr.msk.f32.gmra.mrb[6].mxu0 %vm314_vm1, %v4081_v59  ;;  %v2241_v58 = vld [vmem:[%s3928_s14 + $0x2e] sm:$0xff] }
  0x52   : > { %3212 = vmatprep.mubr.msk.f32.mxu1 %vm314_vm1, %v283_v60  ;;  %3328 = vmatprep.mubr.msk.f32.mxu0 %vm314_vm1, %v4085_v61  ;;  %v2243_v60 = vld [vmem:[%s3928_s14 + $0x3e] sm:$0xff] }
  0x55   : > { %3213 = vmatmul.mubr.msk.f32.gmra.mrb[8].mxu1 %vm314_vm1, %v284_v62  ;;  %3329 = vmatmul.mubr.msk.f32.gmra.mrb[8].mxu0 %vm314_vm1, %v4095_v63  ;;  %v2245_v62 = vld [vmem:[%s3928_s14 + $0x4e] sm:$0xff] }
  0x56   : > { %3215 = vmatprep.mubr.msk.f32.mxu1 %vm314_vm1, %v285_v0  ;;  %3331 = vmatprep.mubr.msk.f32.mxu0 %vm314_vm1, %v4099_v1  ;;  %v2247_v0 = vld [vmem:[%s3928_s14 + $0x5e] sm:$0xff] }
  0x59   : > { %3216 = vmatmul.mubr.msk.f32.gmra.mrb[10].mxu1 %vm314_vm1, %v286_v2  ;;  %3332 = vmatmul.mubr.msk.f32.gmra.mrb[10].mxu0 %vm314_vm1, %v1501_v3  ;;  %v2249_v2 = vld [vmem:[%s3928_s14 + $0x6e] sm:$0xff] }
  0x5a   : > { %3218 = vmatprep.mubr.msk.f32.mxu1 %vm314_vm1, %v287_v4  ;;  %3334 = vmatprep.mubr.msk.f32.mxu0 %vm314_vm1, %v1502_v5  ;;  %v2251_v4 = vld [vmem:[%s3928_s14 + $0x7e] sm:$0xff] }
  0x5d   : > { %3219 = vmatmul.mubr.msk.f32.gmra.mrb[12].mxu1 %vm314_vm1, %v288_v6  ;;  %3335 = vmatmul.mubr.msk.f32.gmra.mrb[12].mxu0 %vm314_vm1, %v1503_v7  ;;  %v2253_v6 = vld [vmem:[%s3928_s14 + $0x8e] sm:$0xff] }
  0x5e   : > { %3221 = vmatprep.mubr.msk.f32.mxu1 %vm314_vm1, %v289_v8  ;;  %3337 = vmatprep.mubr.msk.f32.mxu0 %vm314_vm1, %v1504_v9  ;;  %v2255_v8 = vld [vmem:[%s3928_s14 + $0x9e] sm:$0xff] }
  0x61   : > { %3222 = vmatmul.mubr.msk.f32.gmra.mrb[14].mxu1 %vm314_vm1, %v290_v10  ;;  %3338 = vmatmul.mubr.msk.f32.gmra.mrb[14].mxu0 %vm314_vm1, %v1505_v11  ;;  %v2257_v10 = vld [vmem:[%s3928_s14 + $0xae] sm:$0xff] }
  0x62   : > { %3224 = vmatprep.mubr.msk.f32.mxu1 %vm314_vm1, %v291_v12  ;;  %3340 = vmatprep.mubr.msk.f32.mxu0 %vm314_vm1, %v1506_v13  ;;  %v2535_v12 = vlaneseq }
  0x65   : > { %3225 = vmatmul.mubr.msk.f32.gmra.mrb[16].mxu1 %vm314_vm1, %v292_v14  ;;  %3341 = vmatmul.mubr.msk.f32.gmra.mrb[16].mxu0 %vm314_vm1, %v1507_v15 }
  0x66   : > { %3229 = vmatprep.mubr.msk.f32.mxu1 %vm314_vm1, %v740_v16  ;;  %3345 = vmatprep.mubr.msk.f32.mxu0 %vm314_vm1, %v4026_v47  ;;  %v2000_v47 = vld [vmem:[%s3928_s14 + $0x75] sm:$0xff] }
  0x69   : > { %3230 = vmatmul.mubr.msk.f32.vlgmr.msra.gmra.mrb[0].mxu1 %vm314_vm1, %v741_v17  ;;  %3346 = vmatmul.mubr.msk.f32.vlgmr.msra.gmra.mrb[0].mxu0 %vm314_vm1, %v4045_v51  ;;  %v2004_v51 = vld [vmem:[%s3928_s14 + $0x95] sm:$0xff] }
  0x6a   : > { %3373 = vmatpush3.msk.msra.mxu0 %vm369_vm0, %v4033_v48  ;;  %3232 = vmatprep.mubr.msk.f32.mxu1 %vm314_vm1, %v742_v18  ;;  %v2001_v48 = vld [vmem:[%s3928_s14 + $0x7d] sm:$0xff] }
  0x6b   : > { %3348 = vmatprep.mubr.msk.f32.mxu0 %vm314_vm1, %v4051_v53  ;;  %3257 = vmatpush3.msk.msra.mxu1 %vm369_vm0, %v4038_v49  ;;  %v2002_v49 = vld [vmem:[%s3928_s14 + $0x85] sm:$0xff]  ;;  %v1006_v53 = vld [vmem:[%s3928_s14 + $0x92] sm:$0xff] }
  0x6c   : > { %3401 = vmatprep.subr.msk.mxu0 %vm369_vm0, %v2965_v19 }
  0x6d   : > { %3233 = vmatmul.mubr.msk.f32.gmra.mrb[2].mxu1 %vm314_vm1, %v743_v20  ;;  %3349 = vmatmul.mubr.msk.f32.gmra.mrb[2].mxu0 %vm314_vm1, %v4067_v55  ;;  %v1007_v55 = vld [vmem:[%s3928_s14 + $0x9a] sm:$0xff] }
  0x6e   : > { %3235 = vmatprep.mubr.msk.f32.mxu1 %vm314_vm1, %v744_v21  ;;  %3351 = vmatprep.mubr.msk.f32.mxu0 %vm314_vm1, %v4071_v57  ;;  %v2240_v57 = vld [vmem:[%s3928_s14 + $0x26] sm:$0xff] }
  0x71   : > { %3236 = vmatmul.mubr.msk.f32.gmra.mrb[4].mxu1 %vm314_vm1, %v745_v22  ;;  %3352 = vmatmul.mubr.msk.f32.gmra.mrb[4].mxu0 %vm314_vm1, %v4081_v59  ;;  %v2242_v59 = vld [vmem:[%s3928_s14 + $0x36] sm:$0xff] }
  0x72   : > { %3238 = vmatprep.mubr.msk.f32.mxu1 %vm314_vm1, %v746_v23  ;;  %3354 = vmatprep.mubr.msk.f32.mxu0 %vm314_vm1, %v4085_v61  ;;  %v2244_v61 = vld [vmem:[%s3928_s14 + $0x46] sm:$0xff] }
  0x75   : > { %3239 = vmatmul.mubr.msk.f32.gmra.mrb[6].mxu1 %vm314_vm1, %v747_v24  ;;  %3355 = vmatmul.mubr.msk.f32.gmra.mrb[6].mxu0 %vm314_vm1, %v4095_v63  ;;  %v2246_v63 = vld [vmem:[%s3928_s14 + $0x56] sm:$0xff] }
  0x76   : > { %3241 = vmatprep.mubr.msk.f32.mxu1 %vm314_vm1, %v748_v25  ;;  %3357 = vmatprep.mubr.msk.f32.mxu0 %vm314_vm1, %v4099_v1  ;;  %v2248_v1 = vld [vmem:[%s3928_s14 + $0x66] sm:$0xff] }
  0x79   : > { %3242 = vmatmul.mubr.msk.f32.gmra.mrb[8].mxu1 %vm314_vm1, %v749_v26  ;;  %3358 = vmatmul.mubr.msk.f32.gmra.mrb[8].mxu0 %vm314_vm1, %v1501_v3  ;;  %v2250_v3 = vld [vmem:[%s3928_s14 + $0x76] sm:$0xff] }
  0x7a   : > { %3244 = vmatprep.mubr.msk.f32.mxu1 %vm314_vm1, %v750_v27  ;;  %3360 = vmatprep.mubr.msk.f32.mxu0 %vm314_vm1, %v1502_v5  ;;  %v2252_v5 = vld [vmem:[%s3928_s14 + $0x86] sm:$0xff] }
  0x7d   : > { %3245 = vmatmul.mubr.msk.f32.gmra.mrb[10].mxu1 %vm314_vm1, %v751_v28  ;;  %3361 = vmatmul.mubr.msk.f32.gmra.mrb[10].mxu0 %vm314_vm1, %v1503_v7  ;;  %v2254_v7 = vld [vmem:[%s3928_s14 + $0x96] sm:$0xff] }
  0x7e   : > { %3247 = vmatprep.mubr.msk.f32.mxu1 %vm314_vm1, %v752_v29  ;;  %3363 = vmatprep.mubr.msk.f32.mxu0 %vm314_vm1, %v1504_v9  ;;  %v2256_v9 = vld [vmem:[%s3928_s14 + $0xa6] sm:$0xff] }
  0x81   : > { %3248 = vmatmul.mubr.msk.f32.gmra.mrb[12].mxu1 %vm314_vm1, %v753_v30  ;;  %3364 = vmatmul.mubr.msk.f32.gmra.mrb[12].mxu0 %vm314_vm1, %v1505_v11  ;;  %v3792_v11 = vmov 0.0|0.0  }
  0x82   : > { %3250 = vmatprep.mubr.msk.f32.mxu1 %vm314_vm1, %v754_v31  ;;  %3366 = vmatprep.mubr.msk.f32.mxu0 %vm314_vm1, %v1506_v13  ;;  %v2536_v13 = vshrl.u32 %v2535_v12, 7 }
  0x83   : > { %3441 = vmatprep.subr.bf16.mxu1 %v3792_v11 }
  0x84   : > { %v2541_v14 = vsub.s32 1, %v2536_v13  ;;  %v2537_v16 = vsub.s32 0, %v2536_v13 }
  0x85   : > { %3251 = vmatmul.mubr.msk.f32.gmra.mrb[14].mxu1 %vm314_vm1, %v755_v32  ;;  %3367 = vmatmul.mubr.msk.f32.gmra.mrb[14].mxu0 %vm314_vm1, %v1507_v15  ;;  %v2533_v15 = vld [vmem:[%s4436_s3] sm:$0x3] }
  0x86   : > { %3253 = vmatprep.mubr.msk.f32.mxu1 %vm314_vm1, %v756_v33  ;;  %3369 = vmatprep.mubr.msk.f32.mxu0 %vm314_vm1, %v1756_v34  ;;  %v2542_v17 = vrot.slane %v2533_v15, %v2541_v14 }
  0x89   : > { %3254 = vmatmul.mubr.msk.f32.gmra.mrb[16].mxu1 %vm314_vm1, %v757_v35  ;;  %3370 = vmatmul.mubr.msk.f32.gmra.mrb[16].mxu0 %vm314_vm1, %v1757_v36 }
  0x8a   : > { %3258 = vmatprep.mubr.msk.f32.mxu1 %vm314_vm1, %v742_v18  ;;  %3374 = vmatprep.mubr.msk.f32.mxu0 %vm314_vm1, %v1990_v37  ;;  %v4305_v18 = vrot.slane %v2533_v15, %v2537_v16 }
  0x8d   : > { %3259 = vmatmul.mubr.msk.f32.vlgmr.msra.gmra.mrb[0].mxu1 %vm314_vm1, %v743_v20  ;;  %3375 = vmatmul.mubr.msk.f32.vlgmr.msra.gmra.mrb[0].mxu0 %vm314_vm1, %v1991_v38  ;;  %v4322_v38 = vld [vmem:[%s4435_s2] ss:$0 sm:$0xff] }
  0x8e   : > { %3402 = vmatpush3.msk.msra.mxu0 %vm369_vm0, %v2965_v19  ;;  %3261 = vmatprep.mubr.msk.f32.mxu1 %vm314_vm1, %v744_v21 }
  0x8f   : > { %3377 = vmatprep.mubr.msk.f32.mxu0 %vm314_vm1, %v1992_v39 }
  0x91   : > { %3262 = vmatmul.mubr.msk.f32.gmra.mrb[2].mxu1 %vm314_vm1, %v745_v22  ;;  %3378 = vmatmul.mubr.msk.f32.gmra.mrb[2].mxu0 %vm314_vm1, %v1993_v40 }
  0x92   : > { %3264 = vmatprep.mubr.msk.f32.mxu1 %vm314_vm1, %v746_v23  ;;  %3380 = vmatprep.mubr.msk.f32.mxu0 %vm314_vm1, %v1994_v41 }
  0x95   : > { %3265 = vmatmul.mubr.msk.f32.gmra.mrb[4].mxu1 %vm314_vm1, %v747_v24  ;;  %3381 = vmatmul.mubr.msk.f32.gmra.mrb[4].mxu0 %vm314_vm1, %v1995_v42 }
  0x96   : > { %3267 = vmatprep.mubr.msk.f32.mxu1 %vm314_vm1, %v748_v25  ;;  %3383 = vmatprep.mubr.msk.f32.mxu0 %vm314_vm1, %v1996_v43 }
  0x99   : > { %3268 = vmatmul.mubr.msk.f32.gmra.mrb[6].mxu1 %vm314_vm1, %v749_v26  ;;  %3384 = vmatmul.mubr.msk.f32.gmra.mrb[6].mxu0 %vm314_vm1, %v1997_v44 }
  0x9a   : > { %3270 = vmatprep.mubr.msk.f32.mxu1 %vm314_vm1, %v750_v27  ;;  %3386 = vmatprep.mubr.msk.f32.mxu0 %vm314_vm1, %v1998_v45 }
  0x9d   : > { %3271 = vmatmul.mubr.msk.f32.gmra.mrb[8].mxu1 %vm314_vm1, %v751_v28  ;;  %3387 = vmatmul.mubr.msk.f32.gmra.mrb[8].mxu0 %vm314_vm1, %v1999_v46 }
  0x9e   : > { %3273 = vmatprep.mubr.msk.f32.mxu1 %vm314_vm1, %v752_v29  ;;  %3389 = vmatprep.mubr.msk.f32.mxu0 %vm314_vm1, %v2000_v47 }
  0xa1   : > { %3274 = vmatmul.mubr.msk.f32.gmra.mrb[10].mxu1 %vm314_vm1, %v753_v30  ;;  %3390 = vmatmul.mubr.msk.f32.gmra.mrb[10].mxu0 %vm314_vm1, %v2001_v48 }
  0xa2   : > { %3276 = vmatprep.mubr.msk.f32.mxu1 %vm314_vm1, %v754_v31  ;;  %3392 = vmatprep.mubr.msk.f32.mxu0 %vm314_vm1, %v2002_v49 }
  0xa5   : > { %3277 = vmatmul.mubr.msk.f32.gmra.mrb[12].mxu1 %vm314_vm1, %v755_v32  ;;  %3393 = vmatmul.mubr.msk.f32.gmra.mrb[12].mxu0 %vm314_vm1, %v2003_v50 }
  0xa6   : > { %3279 = vmatprep.mubr.msk.f32.mxu1 %vm314_vm1, %v756_v33  ;;  %3395 = vmatprep.mubr.msk.f32.mxu0 %vm314_vm1, %v2004_v51 }
  0xa9   : > { %3280 = vmatmul.mubr.msk.f32.gmra.mrb[14].mxu1 %vm314_vm1, %v757_v35  ;;  %3396 = vmatmul.mubr.msk.f32.gmra.mrb[14].mxu0 %vm314_vm1, %v2005_v52 }
  0xaa   : > { %3282 = vmatprep.mubr.msk.f32.mxu1 %vm314_vm1, %v1006_v53  ;;  %3398 = vmatprep.mubr.msk.f32.mxu0 %vm314_vm1, %v2006_v54 }
  0xad   : > { %3283 = vmatmul.mubr.msk.f32.gmra.mrb[16].mxu1 %vm314_vm1, %v1007_v55  ;;  %3399 = vmatmul.mubr.msk.f32.gmra.mrb[16].mxu0 %vm314_vm1, %v2007_v56 }
  0xae   : > { %3403 = vmatprep.mubr.msk.f32.mxu0 %vm314_vm1, %v2240_v57  ;;  %2986 = vmatprep.mubr.msk.f32.mxu1 %vm2544_vm2, %v2542_v17 }
  0xb1   : > { %3404 = vmatmul.mubr.msk.f32.vlgmr.msra.gmra.mrb[0].mxu0 %vm314_vm1, %v2241_v58 }
  0xb2   : > { %3406 = vmatprep.mubr.msk.f32.mxu0 %vm314_vm1, %v2242_v59 }
  0xb5   : > { %3407 = vmatmul.mubr.msk.f32.gmra.mrb[2].mxu0 %vm314_vm1, %v2243_v60 }
  0xb6   : > { %3409 = vmatprep.mubr.msk.f32.mxu0 %vm314_vm1, %v2244_v61 }
  0xb9   : > { %3410 = vmatmul.mubr.msk.f32.gmra.mrb[4].mxu0 %vm314_vm1, %v2245_v62 }
  0xba   : > { %3412 = vmatprep.mubr.msk.f32.mxu0 %vm314_vm1, %v2246_v63 }
  0xbd   : > { %3413 = vmatmul.mubr.msk.f32.gmra.mrb[6].mxu0 %vm314_vm1, %v2247_v0 }
  0xbe   : > { %3415 = vmatprep.mubr.msk.f32.mxu0 %vm314_vm1, %v2248_v1 }
  0xc1   : > { %3416 = vmatmul.mubr.msk.f32.gmra.mrb[8].mxu0 %vm314_vm1, %v2249_v2 }
  0xc2   : > { %3418 = vmatprep.mubr.msk.f32.mxu0 %vm314_vm1, %v2250_v3 }
  0xc5   : > { %3419 = vmatmul.mubr.msk.f32.gmra.mrb[10].mxu0 %vm314_vm1, %v2251_v4 }
  0xc6   : > { %3421 = vmatprep.mubr.msk.f32.mxu0 %vm314_vm1, %v2252_v5 }
  0xc9   : > { %3422 = vmatmul.mubr.msk.f32.gmra.mrb[12].mxu0 %vm314_vm1, %v2253_v6 }
  0xca   : > { %3424 = vmatprep.mubr.msk.f32.mxu0 %vm314_vm1, %v2254_v7 }
  0xcd   : > { %3425 = vmatmul.mubr.msk.f32.gmra.mrb[14].mxu0 %vm314_vm1, %v2255_v8 }
  0xce   : > { %3427 = vmatprep.mubr.msk.f32.mxu0 %vm314_vm1, %v2256_v9 }
  0xd1   : > { %3428 = vmatmul.mubr.msk.f32.gmra.mrb[16].mxu0 %vm314_vm1, %v2257_v10 }
 0x160   : > { %v3260_v19 = vpop.f32.mrb[0].mxu1 }
 0x161   : > { %v1133_v20 = vpop.f32.mrb[1].mxu1 }
 0x164   : > { %v3263_v21 = vpop.f32.mrb[2].mxu1 }
 0x165   : > { %v1143_v22 = vpop.f32.mrb[3].mxu1 }
 0x168   : > { %v3266_v23 = vpop.f32.mrb[4].mxu1 }
 0x169   : > { %v1153_v24 = vpop.f32.mrb[5].mxu1 }
 0x16c   : > { %v3269_v25 = vpop.f32.mrb[6].mxu1 }
 0x16d   : > { %v1163_v26 = vpop.f32.mrb[7].mxu1 }
 0x170   : > { %v3272_v27 = vpop.f32.mrb[8].mxu1 }
 0x171   : > { %v1173_v28 = vpop.f32.mrb[9].mxu1 }
 0x174   : > { %v3275_v29 = vpop.f32.mrb[10].mxu1 }
 0x175   : > { %v1183_v30 = vpop.f32.mrb[11].mxu1 }
 0x178   : > { %v4307_v31 = vpop.f32.mrb[12].mxu1 }
 0x179   : > { %v4309_v32 = vpop.f32.mrb[13].mxu1 }
 0x17c   : > { %v4311_v33 = vpop.f32.mrb[14].mxu1 }
 0x17d   : > { %v4313_v34 = vpop.f32.mrb[15].mxu1 }
 0x180   : > { %v4315_v35 = vpop.f32.mrb[16].mxu1 }
 0x181   : > { %v4317_v36 = vpop.f32.mrb[17].mxu1 }
 0x184   : > { %v3405_v37 = vpop.f32.mrb[0].mxu0 }
 0x185   : > { %v3474_v39 = vadd.f32 %v3405_v37, %v3260_v19  ;;  %v2383_v40 = vpop.f32.mrb[1].mxu0 }
 0x186   : > { %v3475_v41 = vadd.f32 %v2383_v40, %v1133_v20 }
 0x187   : > { %v2498_v42 = vadd.f32 %v3474_v39, %v4322_v38 }
 0x188   : > { %v2497_v43 = vadd.f32 %v3475_v41, %v4322_v38  ;;  %v3408_v44 = vpop.f32.mrb[2].mxu0 }
 0x189   : > { %v2516_v45 = vmax.f32 %v2498_v42, 0.0  ;;  %v3476_v46 = vadd.f32 %v3408_v44, %v3263_v21  ;;  %v2393_v47 = vpop.f32.mrb[3].mxu0 }
 0x18a   : > { %v2515_v48 = vmax.f32 %v2497_v43, 0.0  ;;  %v3477_v49 = vadd.f32 %v2393_v47, %v1143_v22 }
 0x18b   : > { %v2500_v50 = vadd.f32 %v3476_v46, %v4322_v38 }
 0x18c   : > { %v3442_v51 = vpack.c.bf16 %v2516_v45, %v2515_v48  ;;  %v2499_v52 = vadd.f32 %v3477_v49, %v4322_v38  ;;  %v3411_v53 = vpop.f32.mrb[4].mxu0 }
 0x18d   : > { %v2518_v54 = vmax.f32 %v2500_v50, 0.0  ;;  %v3478_v55 = vadd.f32 %v3411_v53, %v3266_v23  ;;  %v2403_v56 = vpop.f32.mrb[5].mxu0 }
 0x18e   : > { %v2517_v57 = vmax.f32 %v2499_v52, 0.0  ;;  %v3479_v58 = vadd.f32 %v2403_v56, %v1153_v24  ;;  %3443 = vmatpush1.bf16.msra.mxu1 %v3442_v51 }
 0x18f   : > { %v2502_v59 = vadd.f32 %v3478_v55, %v4322_v38  ;;  %3444 = vmatprep.subr.bf16.mxu1 %v3792_v11 }
 0x190   : > { %v3445_v60 = vpack.c.bf16 %v2518_v54, %v2517_v57  ;;  %v2501_v61 = vadd.f32 %v3479_v58, %v4322_v38  ;;  %v3414_v62 = vpop.f32.mrb[6].mxu0 }
 0x191   : > { %v2520_v63 = vmax.f32 %v2502_v59, 0.0  ;;  %v3480_v0 = vadd.f32 %v3414_v62, %v3269_v25  ;;  %v2413_v1 = vpop.f32.mrb[7].mxu0 }
 0x192   : > { %v2519_v2 = vmax.f32 %v2501_v61, 0.0  ;;  %v3481_v3 = vadd.f32 %v2413_v1, %v1163_v26  ;;  %3446 = vmatpush1.bf16.msra.mxu1 %v3445_v60 }
 0x193   : > { %v2504_v4 = vadd.f32 %v3480_v0, %v4322_v38  ;;  %3447 = vmatprep.subr.bf16.mxu1 %v3792_v11 }
 0x194   : > { %v3448_v5 = vpack.c.bf16 %v2520_v63, %v2519_v2  ;;  %v2503_v6 = vadd.f32 %v3481_v3, %v4322_v38  ;;  %v3417_v7 = vpop.f32.mrb[8].mxu0 }
 0x195   : > { %v2522_v8 = vmax.f32 %v2504_v4, 0.0  ;;  %v3482_v9 = vadd.f32 %v3417_v7, %v3272_v27  ;;  %v2423_v10 = vpop.f32.mrb[9].mxu0 }
 0x196   : > { %v2521_v12 = vmax.f32 %v2503_v6, 0.0  ;;  %v3483_v13 = vadd.f32 %v2423_v10, %v1173_v28  ;;  %3449 = vmatpush1.bf16.msra.mxu1 %v3448_v5 }
 0x197   : > { %v2506_v14 = vadd.f32 %v3482_v9, %v4322_v38  ;;  %3450 = vmatprep.subr.bf16.mxu1 %v3792_v11 }
 0x198   : > { %v3451_v15 = vpack.c.bf16 %v2522_v8, %v2521_v12  ;;  %v2505_v16 = vadd.f32 %v3483_v13, %v4322_v38  ;;  %v3420_v17 = vpop.f32.mrb[10].mxu0 }
 0x199   : > { %v2524_v19 = vmax.f32 %v2506_v14, 0.0  ;;  %v3484_v20 = vadd.f32 %v3420_v17, %v3275_v29  ;;  %v2433_v21 = vpop.f32.mrb[11].mxu0 }
 0x19a   : > { %v2523_v22 = vmax.f32 %v2505_v16, 0.0  ;;  %v3485_v23 = vadd.f32 %v2433_v21, %v1183_v30  ;;  %3452 = vmatpush1.bf16.msra.mxu1 %v3451_v15 }
 0x19b   : > { %v2508_v24 = vadd.f32 %v3484_v20, %v4322_v38  ;;  %3453 = vmatprep.subr.bf16.mxu1 %v3792_v11 }
 0x19c   : > { %v3454_v25 = vpack.c.bf16 %v2524_v19, %v2523_v22  ;;  %v2507_v26 = vadd.f32 %v3485_v23, %v4322_v38  ;;  %v3423_v27 = vpop.f32.mrb[12].mxu0 }
 0x19d   : > { %v2526_v28 = vmax.f32 %v2508_v24, 0.0  ;;  %v3486_v37 = vadd.f32 %v3423_v27, %v4307_v31  ;;  %v2443_v39 = vpop.f32.mrb[13].mxu0 }
 0x19e   : > { %v2525_v40 = vmax.f32 %v2507_v26, 0.0  ;;  %v3487_v41 = vadd.f32 %v2443_v39, %v4309_v32  ;;  %3455 = vmatpush1.bf16.msra.mxu1 %v3454_v25 }
 0x19f   : > { %v2510_v29 = vadd.f32 %v3486_v37, %v4322_v38  ;;  %3456 = vmatprep.subr.bf16.mxu1 %v3792_v11 }
 0x1a0   : > { %v3457_v30 = vpack.c.bf16 %v2526_v28, %v2525_v40  ;;  %v2509_v42 = vadd.f32 %v3487_v41, %v4322_v38  ;;  %v3426_v43 = vpop.f32.mrb[14].mxu0 }
 0x1a1   : > { %v2528_v44 = vmax.f32 %v2510_v29, 0.0  ;;  %v3488_v45 = vadd.f32 %v3426_v43, %v4311_v33  ;;  %v2453_v46 = vpop.f32.mrb[15].mxu0 }
 0x1a2   : > { %v2527_v47 = vmax.f32 %v2509_v42, 0.0  ;;  %v3489_v31 = vadd.f32 %v2453_v46, %v4313_v34  ;;  %3458 = vmatpush1.bf16.msra.mxu1 %v3457_v30 }
 0x1a3   : > { %v2512_v48 = vadd.f32 %v3488_v45, %v4322_v38  ;;  %3459 = vmatprep.subr.bf16.mxu1 %v3792_v11 }
 0x1a4   : > { %v3460_v32 = vpack.c.bf16 %v2528_v44, %v2527_v47  ;;  %v2511_v49 = vadd.f32 %v3489_v31, %v4322_v38  ;;  %v3429_v50 = vpop.f32.mrb[16].mxu0 }
 0x1a5   : > { %v2530_v51 = vmax.f32 %v2512_v48, 0.0  ;;  %v3490_v52 = vadd.f32 %v3429_v50, %v4315_v35  ;;  %v2463_v53 = vpop.f32.mrb[17].mxu0 }
 0x1a6   : > { %v2529_v54 = vmax.f32 %v2511_v49, 0.0  ;;  %v3491_v33 = vadd.f32 %v2463_v53, %v4317_v36  ;;  %3461 = vmatpush1.bf16.msra.mxu1 %v3460_v32  ;;  %v3793_v36 = vmov (!%p2987_p0), 0.0  }
 0x1a7   : > { %v2514_v34 = vadd.f32 %v3490_v52, %v4322_v38  ;;  %3462 = vmatprep.subr.bf16.mxu1 %v3792_v11  ;;  %2622 = vst.msk [vmem:[#allocation2] sm:$0x1] (!%p2987_p0), %vm2621_vm3, %v3793_v36 }
 0x1a8   : > { %v3463_v55 = vpack.c.bf16 %v2530_v51, %v2529_v54  ;;  %v2513_v56 = vadd.f32 %v3491_v33, %v4322_v38 }
 0x1a9   : > { %v2532_v57 = vmax.f32 %v2514_v34, 0.0 }
 0x1aa   : > { %v2531_v58 = vmax.f32 %v2513_v56, 0.0  ;;  %3464 = vmatpush1.bf16.msra.mxu1 %v3463_v55 }
 0x1ab   : > { %3465 = vmatprep.subr.bf16.mxu1 %v3792_v11 }
 0x1ac   : > { %v3466_v59 = vpack.c.bf16 %v2532_v57, %v2531_v58 }
 0x1ae   : > { %3467 = vmatpush1.bf16.msra.mxu1 %v3466_v59 }
 0x1b1   : > { %2612 = vmatmul.mubr.f32.vlgmr.msra.gmra.mrb[18].mxu1 %v4305_v18 }
 0x27f   : > { %2620 = sbr.rel (%p2987_p0) target bundleno = 646 (0x286), region = 48 }
 0x284   : > { %v2613_v35 = vpop.f32.mrb[18].mxu1 }
 0x285   : > { %v2615_v60 = vpop.f32.mrb[19].mxu1 }
 0x286 PF: > { %v2623_v38 = vld [vmem:[#allocation2] sm:$0x1]  ;;  %vm2625_vm4 = vcmask 253952   ;;  %p2988_p1 = scmp.ne.s32.totalorder %s3774_s24, 1 }
 0x287   : > { %v2624_v61 = vadd.f32 %v2623_v38, %v2613_v35  ;;  %v2632_v11 = vld [vmem:[%s4437_s4] sm:$0xff] (!%p2988_p1)  ;;  %v2633_v18 = vld [vmem:[%s4437_s4 + $0x8] sm:$0xff] (!%p2988_p1)  ;;  %v2634_v62 = vld [vmem:[%s4437_s4 + $0x10] sm:$0xff] (!%p2988_p1)  ;;  %v3794_v63 = vmov (!%p2988_p1), 0.0|0.0   ;;  %vm3795_vm5 = vmmov (!%p2988_p1), 0   ;;  %v3796_v2 = vmov (!%p2988_p1), 0.0  }
 0x288   : > { %2630 = sbr.rel (%p2988_p1) target bundleno = 872 (0x368), region = 52  ;;  %3468 = vmatprep.subr.bf16.mxu0 (!%p2988_p1), %v3794_v63  ;;  %v3469_v0 = vpack.c.bf16 (!%p2988_p1), %v2633_v18, %v2632_v11  ;;  %v2635_v1 = vld [vmem:[%s4437_s4 + $0x18] sm:$0xff] (!%p2988_p1)  ;;  %3438 = vmatprep.mubr.msk.f32.mxu0 (!%p2988_p1), %vm3795_vm5, %v3796_v2  ;;  %vm2637_vm6 = vcmask (!%p2988_p1), 261120   ;;  %v2636_v5 = vld [vmem:[%s4438_s5] sm:$0x1] (!%p2988_p1) }
 0x289   : > { %2626 = vst.msk [vmem:[#allocation2] sm:$0x1] %vm2625_vm4, %v2624_v61  ;;  %v3472_v3 = vpack.c.bf16 (!%p2988_p1), %v2635_v1, %v2634_v62 }
 0x28a   : > { %3470 = vmatpush3.bf16.msra.mxu0 (!%p2988_p1), %v3469_v0 }
 0x28b   : > { %3471 = vmatprep.subr.bf16.mxu0 (!%p2988_p1), %v3794_v63 }
 0x28e   : > { %3473 = vmatpush3.bf16.msra.mxu0 (!%p2988_p1), %v3472_v3 }
 0x290   : > { %v2631_v4 = vld [vmem:[#allocation2] sm:$0x1] }
 0x291   : > { %3439 = vmatmul.mubr.msk.f32.vlgmr.msra.gmra.mrb[0].mxu0 %vm2637_vm6, %v2631_v4 }
 0x364   : > { %v2707_v6 = vpop.f32.mrb[0].mxu0 }
 0x365   : > { %v2708_v7 = vadd.f32 %v2707_v6, %v2636_v5  ;;  %v3440_v8 = vpop.f32.mrb[1].mxu0 }
 0x367   : > { %2711 = vst [vmem:[%s4359_s15] sm:$0x1] %v2708_v7 }
 0x368 PF: > { %s2990_s12 = sshll.u32 %s3778_s25, 4  ;;  %s2725_s19 = sshll.u32 %s4359_s15, 4  ;;  %s2726_s19 = int_to_ptr.vmem [resolvable:$true] %s2725_s19 }
 0x369   : > { %s4383_s18 = scalar_lea.hbm %s4439_s6, %s2990_s12  ;;  %s4443_s20 = sand.u32 1, %s3766_s22  }
 0x36a   : > { %s2713_s29 = scalar_lea.sflag [#allocation4], %s4443_s20  ;;  %s3696_s30 = scalar_lea.vmem %s2726_s19, 16 }
 0x36b   : > { %p3697_p2 = scmp.ne.s32.totalorder %s2726_s19, %s3696_s30  ;;  %s3797_s14 = smov [#allocation3]  }
 0x36c   : > { %s3700_s24 = sshll.u32 %s3797_s14, 4  ;;  %s3701_s24 = int_to_ptr.vmem [resolvable:$false] %s3700_s24 }
 0x36d   : > { %p3698_p4 = pnand %p3697_p2, %p3882_p3  ;;  %s3702_s11 = scalar_lea.vmem %s3701_s24, 32 }
 0x36e   : > { %p3703_p6 = scmp.lt.s32.totalorder %s2726_s19, %s3701_s24  ;;  %p3704_p7 = scmp.lt.s32.totalorder %s3702_s11, %s3696_s30 }
 0x36f   : > { %p3699_p5 = pneg %p3698_p4 }
 0x370   : > { %p3705_p8 = por %p3704_p7, %p3703_p6 }
 0x372   : > { %p3706_p10 = pnand %p3705_p8, %p3699_p5 }
 0x374   : > { %3709 = shalt.err (!%p3706_p10)
}
 0x375   : > { %s3710_s25 = scalar_lea.hbm %s4383_s18, 16  ;;  %s3714_s16 = scalar_lea.hbm %s4439_s6, 32 }
 0x376   : > { %p3711_p11 = scmp.ne.s32.totalorder %s4383_s18, %s3710_s25  ;;  %p3715_p0 = scmp.lt.u32.totalorder %s4383_s18, %s4439_s6 }
 0x377   : > { %p3716_p1 = scmp.lt.u32.totalorder %s3714_s16, %s3710_s25  ;;  %p3718_p4 = scmp.lt.u32.totalorder %s3710_s25, %s4383_s18 }
 0x378   : > { %p3712_p12 = pnand %p3711_p11, %p3882_p3 }
 0x379   : > { %p3717_p2 = por %p3716_p1, %p3715_p0 }
 0x37a   : > { %p3713_p13 = pneg %p3712_p12 }
 0x37b   : > { %p3719_p5 = por %p3718_p4, %p3717_p2 }
 0x37d   : > { %p3720_p6 = pnand %p3719_p5, %p3713_p13 }
 0x37f   : > { %3723 = shalt.err (!%p3720_p6)
}
 0x380   : > { %3620 = dma.vmem_to_hbm [thread:$0]  (%p3882_p3), %s2726_s19, 16, %s4383_s18, %s2713_s29  }
 0x381 PF: > { %p3626_p7 = scmp.ge.s32.totalorder %s3790_s28, 2  ;;  %s2737_s30 = sand.u32 1, %s3762_s21  }
 0x382   : > { %s2738_s14 = scalar_lea.sflag [#allocation4], %s2737_s30 }
 0x383   : > { %p3623_p8 = pnand %p3626_p7, %p3892_p9 }
 0x385   : > { %3757 = dma.done.wait (!%p3623_p8), %s2738_s14, 16  }
 0x386   : > { %3759 = vsyncadd (!%p3623_p8), %s2738_s14, 4294967280  ;;  %s19_s28 = sadd.s32 1, %s3790_s28   ;;  %s4444_s21 = smov %s3766_s22 }
 0x387   : > { %p16_p10 = scmp.ge.s32.totalorder %s19_s28, 6   ;;  %s4445_s22 = smov %s3770_s23 }
 0x388   : > { %s4446_s23 = smov %s3900_s13  ;;  %s4447_s24 = smov %s3782_s26 }
 0x389   : > { %s4448_s25 = smov %s3786_s27  ;;  %s4449_s26 = smov %s4452_s7 }
 0x38a   : > { %s4450_s27 = smov %s4456_s8  ;;  %18 = sbr.rel (!%p16_p10) target bundleno = 5 (0x5), region = 95 }
 0x391   :  { %2742 = vsyncpa [#allocation4], 1 }
 0x392   :  { %2744 = vsyncpa [#allocation4 + $0x1], 1 }

</bundles_post_ra>
